<compile_context>
chip_gen: v6e
topology: v6e:2x2x1
jax: 0.10.0
libtpu: 0.0.40
codegen_flags: <defaults>
</compile_context>

<pallas_src>
import functools

import jax
import jax.numpy as jnp
from jax.experimental import pallas as pl
from jax.experimental.pallas import tpu as pltpu


def _cross_attn_kernel(x_ref, k_ref, v_ref,
                       wq_ref, wk_ref, wv_ref, wp_ref, bp_ref,
                       o_ref, *, num_heads):
    """One grid step = one batch element. All matmuls are head-batched dot_generals."""
    f32 = jnp.float32
    cdt = wq_ref.dtype                      # MXU compute dtype (bf16)

    H = num_heads
    nq = x_ref.shape[1]
    nk = k_ref.shape[1]
    nv = v_ref.shape[1]
    c = x_ref.shape[2]

    # (1, N, C) input blocks, broadcast over heads so every matmul below is a plain
    # leading-dim-batched dot_general: no reshapes, transposes, per-head lane slices
    # or masked partial stores inside the kernel.
    xh = jnp.broadcast_to(x_ref[...].astype(cdt), (H, nq, c))
    kh = jnp.broadcast_to(k_ref[...].astype(cdt), (H, nk, c))
    vh = jnp.broadcast_to(v_ref[...].astype(cdt), (H, nv, c))

    # Head-major projections; query scale already folded into wq on the host.
    # qkv_bias=False in this module config, so no projection biases.
    q = jnp.einsum('hnc,hcd->hnd', xh, wq_ref[...], preferred_element_type=f32)
    k = jnp.einsum('hnc,hcd->hnd', kh, wk_ref[...], preferred_element_type=f32)
    v = jnp.einsum('hnc,hcd->hnd', vh, wv_ref[...], preferred_element_type=f32)

    # Scores: batched NT matmul (no materialized transpose); softmax in f32.
    s = jnp.einsum('hqd,hkd->hqk', q.astype(cdt), k.astype(cdt),
                   preferred_element_type=f32)                      # (H, Nq, Nk)
    s = s - jnp.max(s, axis=-1, keepdims=True)
    p = jnp.exp(s)
    # EUP approximate reciprocal instead of a VALU divide.
    p = p * pl.reciprocal(jnp.sum(p, axis=-1, keepdims=True), approx=True)
    # TODO(synk): attn_drop / proj_drop omitted (identity at p=0.0 inference).

    ctx = jnp.einsum('hqk,hkd->hqd', p.astype(cdt), v.astype(cdt),
                     preferred_element_type=f32)                    # (H, Nq, hd)

    # Fused output projection: per-head (hd -> C) matmul then reduce over heads.
    y = jnp.einsum('hqd,hdc->hqc', ctx.astype(cdt), wp_ref[...],
                   preferred_element_type=f32)                      # (H, Nq, C)
    y = jnp.sum(y, axis=0) + bp_ref[...].astype(f32)                # (Nq, C)
    o_ref[0] = y.astype(o_ref.dtype)


def cross_attention(x, k, v, params, *, num_heads, compute_dtype=jnp.bfloat16):
    """x: (B, N, C); k: (B, Nk, C); v: (B, Nv, C). Returns (B, N, C)."""
    B, N, C = x.shape
    Bk, Nk, Ck = k.shape
    Bv, Nv, Cv = v.shape
    assert Bk == B and Bv == B and Ck == C and Cv == C, "batch/channel mismatch"
    assert Nk == Nv, "cross-attention requires Nk == Nv (attn @ v)"

    wq, wk, wv, wp, bp = (params["wq"], params["wk"], params["wv"],
                          params["wp"], params["bp"])
    A = wq.shape[0]                              # all_head_dim
    assert A % num_heads == 0, "all_head_dim must divide evenly by num_heads"
    hd = A // num_heads
    scale = hd ** (-0.5)

    # Host-side prep: per-head weight slabs, query scale folded in, cast to the MXU
    # compute dtype (bf16 is MXU-native on v5e/v6e/v7x; kernel keeps f32 accumulation).
    def per_head_in(w):                          # (A, C) Linear weight -> (H, C, hd)
        return jnp.transpose(w.reshape(num_heads, hd, C), (0, 2, 1))

    wq_h = (per_head_in(wq) * scale).astype(compute_dtype)          # (H, C, hd)
    wk_h = per_head_in(wk).astype(compute_dtype)                    # (H, C, hd)
    wv_h = per_head_in(wv).astype(compute_dtype)                    # (H, C, hd)
    wp_h = wp.T.reshape(num_heads, hd, C).astype(compute_dtype)     # (H, hd, C)
    bp2 = bp.reshape(1, C).astype(jnp.float32)

    kernel = functools.partial(_cross_attn_kernel, num_heads=num_heads)

    out = pl.pallas_call(
        kernel,
        out_shape=jax.ShapeDtypeStruct((B, N, C), x.dtype),
        grid_spec=pltpu.PrefetchScalarGridSpec(
            num_scalar_prefetch=0,
            grid=(B,),
            in_specs=[
                pl.BlockSpec((1, N, C), lambda b: (b, 0, 0)),             # x
                pl.BlockSpec((1, Nk, C), lambda b: (b, 0, 0)),            # k
                pl.BlockSpec((1, Nv, C), lambda b: (b, 0, 0)),            # v
                pl.BlockSpec((num_heads, C, hd), lambda b: (0, 0, 0)),    # Wq (scaled)
                pl.BlockSpec((num_heads, C, hd), lambda b: (0, 0, 0)),    # Wk
                pl.BlockSpec((num_heads, C, hd), lambda b: (0, 0, 0)),    # Wv
                pl.BlockSpec((num_heads, hd, C), lambda b: (0, 0, 0)),    # Wproj
                pl.BlockSpec((1, C), lambda b: (0, 0)),                   # bproj
            ],
            out_specs=pl.BlockSpec((1, N, C), lambda b: (b, 0, 0)),
        ),
        compiler_params=pltpu.CompilerParams(
            dimension_semantics=("parallel",)),
    )(x, k, v, wq_h, wk_h, wv_h, wp_h, bp2)

    return out


def cross_attention_ref(x, k, v, params, *, num_heads):
    """Pure-JAX f32 reference mirroring the PyTorch forward, for validation."""
    B, N, C = x.shape
    wq, wk, wv, wp, bp = (params["wq"], params["wk"], params["wv"],
                          params["wp"], params["bp"])
    A = wq.shape[0]
    hd = A // num_heads
    scale = hd ** (-0.5)

    q = jnp.einsum("bnc,ac->bna", x, wq).reshape(B, N, num_heads, hd).transpose(0, 2, 1, 3)
    kk = jnp.einsum("bnc,ac->bna", k, wk).reshape(B, -1, num_heads, hd).transpose(0, 2, 1, 3)
    vv = jnp.einsum("bnc,ac->bna", v, wv).reshape(B, -1, num_heads, hd).transpose(0, 2, 1, 3)
    q = q * scale
    attn = jnp.einsum("bhqd,bhkd->bhqk", q, kk)
    attn = jax.nn.softmax(attn, axis=-1)
    out = jnp.einsum("bhqk,bhkd->bhqd", attn, vv).transpose(0, 2, 1, 3).reshape(B, N, A)
    return jnp.einsum("bna,ca->bnc", out, wp) + bp


if __name__ == "__main__":
    # Small shapes consistent with the module: dim=32, num_heads=8 -> head_dim=4.
    # Nk/Nv chosen as a sublane-aligned multiple of 8.
    B, N, Nk, Nv, C = 2, 8, 16, 16, 32
    num_heads = 8
    all_head_dim = C  # attn_head_dim=None -> head_dim = dim // num_heads

    key = jax.random.PRNGKey(0)
    kx, kk_, kv_, k1, k2, k3, k4, k5 = jax.random.split(key, 8)

    x = jax.random.normal(kx, (B, N, C), dtype=jnp.float32)
    k_in = jax.random.normal(kk_, (B, Nk, C), dtype=jnp.float32)
    v_in = jax.random.normal(kv_, (B, Nv, C), dtype=jnp.float32)

    params = {
        "wq": jax.random.normal(k1, (all_head_dim, C), dtype=jnp.float32) * 0.08,
        "wk": jax.random.normal(k2, (all_head_dim, C), dtype=jnp.float32) * 0.08,
        "wv": jax.random.normal(k3, (all_head_dim, C), dtype=jnp.float32) * 0.08,
        "wp": jax.random.normal(k4, (C, all_head_dim), dtype=jnp.float32) * 0.08,
        "bp": jax.random.normal(k5, (C,), dtype=jnp.float32) * 0.02,
    }

    out = cross_attention(x, k_in, v_in, params, num_heads=num_heads)
    out = jax.block_until_ready(out)

    ref = cross_attention_ref(x, k_in, v_in, params, num_heads=num_heads)
    assert out.shape == (B, N, C)
    # Tolerance covers bf16 MXU operands (f32 accumulation/softmax) plus the EUP
    # approximate reciprocal in the softmax normalization.
    assert jnp.allclose(out, ref, atol=3e-2, rtol=3e-2), "mismatch vs JAX reference"

    print("KERNEL_OK")
</pallas_src>

<mosaic_0001>
module attributes {stable_mosaic.version = 11 : i64} {
  func.func @_cross_attn_kernel(%arg0: i32, %arg1: memref<1x8x32xf32, #tpu.memory_space<vmem>>, %arg2: memref<1x16x32xf32, #tpu.memory_space<vmem>>, %arg3: memref<1x16x32xf32, #tpu.memory_space<vmem>>, %arg4: memref<8x32x4xbf16, #tpu.memory_space<vmem>>, %arg5: memref<8x32x4xbf16, #tpu.memory_space<vmem>>, %arg6: memref<8x32x4xbf16, #tpu.memory_space<vmem>>, %arg7: memref<8x4x32xbf16, #tpu.memory_space<vmem>>, %arg8: memref<1x32xf32, #tpu.memory_space<vmem>>, %arg9: memref<1x8x32xf32, #tpu.memory_space<vmem>>) attributes {dimension_semantics = [#tpu.dimension_semantics<parallel>], iteration_bounds = array<i64: 2>, scalar_prefetch = 0 : i64, scratch_operands = 0 : i64, tpu.core_type = #tpu.core_type<tc>, window_params = [{transform_indices = @transform_0, window_bounds = array<i64: 1, 8, 32>}, {transform_indices = @transform_1, window_bounds = array<i64: 1, 16, 32>}, {transform_indices = @transform_2, window_bounds = array<i64: 1, 16, 32>}, {pipeline_mode = #tpu.pipeline_mode<synchronous>, transform_indices = @transform_3, window_bounds = array<i64: 8, 32, 4>}, {pipeline_mode = #tpu.pipeline_mode<synchronous>, transform_indices = @transform_4, window_bounds = array<i64: 8, 32, 4>}, {pipeline_mode = #tpu.pipeline_mode<synchronous>, transform_indices = @transform_5, window_bounds = array<i64: 8, 32, 4>}, {pipeline_mode = #tpu.pipeline_mode<synchronous>, transform_indices = @transform_6, window_bounds = array<i64: 8, 4, 32>}, {pipeline_mode = #tpu.pipeline_mode<synchronous>, transform_indices = @transform_7, window_bounds = array<i64: 1, 32>}, {transform_indices = @transform_8, window_bounds = array<i64: 1, 8, 32>}]} {
    %c0 = arith.constant 0 : index
    %c0_0 = arith.constant 0 : index
    %c0_1 = arith.constant 0 : index
    %0 = vector.load %arg1[%c0, %c0_0, %c0_1] : memref<1x8x32xf32, #tpu.memory_space<vmem>>, vector<1x8x32xf32>
    %1 = arith.truncf %0 : vector<1x8x32xf32> to vector<1x8x32xbf16>
    %2 = vector.shape_cast %1 : vector<1x8x32xbf16> to vector<1x8x32xbf16>
    %3 = vector.broadcast %2 : vector<1x8x32xbf16> to vector<8x8x32xbf16>
    %c0_2 = arith.constant 0 : index
    %c0_3 = arith.constant 0 : index
    %c0_4 = arith.constant 0 : index
    %4 = vector.load %arg2[%c0_2, %c0_3, %c0_4] : memref<1x16x32xf32, #tpu.memory_space<vmem>>, vector<1x16x32xf32>
    %5 = arith.truncf %4 : vector<1x16x32xf32> to vector<1x16x32xbf16>
    %6 = vector.shape_cast %5 : vector<1x16x32xbf16> to vector<1x16x32xbf16>
    %7 = vector.broadcast %6 : vector<1x16x32xbf16> to vector<8x16x32xbf16>
    %c0_5 = arith.constant 0 : index
    %c0_6 = arith.constant 0 : index
    %c0_7 = arith.constant 0 : index
    %8 = vector.load %arg3[%c0_5, %c0_6, %c0_7] : memref<1x16x32xf32, #tpu.memory_space<vmem>>, vector<1x16x32xf32>
    %9 = arith.truncf %8 : vector<1x16x32xf32> to vector<1x16x32xbf16>
    %10 = vector.shape_cast %9 : vector<1x16x32xbf16> to vector<1x16x32xbf16>
    %11 = vector.broadcast %10 : vector<1x16x32xbf16> to vector<8x16x32xbf16>
    %c0_8 = arith.constant 0 : index
    %c0_9 = arith.constant 0 : index
    %c0_10 = arith.constant 0 : index
    %12 = vector.load %arg4[%c0_8, %c0_9, %c0_10] : memref<8x32x4xbf16, #tpu.memory_space<vmem>>, vector<8x32x4xbf16>
    "tpu.trace_start"() <{level = 10 : i32, message = "hnc,hcd->hnd"}> : () -> ()
    %cst = arith.constant dense<0.000000e+00> : vector<8x8x4xf32>
    %13 = tpu.matmul %3, %12, %cst {dimension_numbers = #tpu.dot_dimension_numbers<[2], [1], [1], [2], [0, 0, 0, 1, 1, 2], [0], [0]>} : vector<8x8x32xbf16>, vector<8x32x4xbf16>, vector<8x8x4xf32> -> vector<8x8x4xf32>
    "tpu.trace_stop"() : () -> ()
    %c0_11 = arith.constant 0 : index
    %c0_12 = arith.constant 0 : index
    %c0_13 = arith.constant 0 : index
    %14 = vector.load %arg5[%c0_11, %c0_12, %c0_13] : memref<8x32x4xbf16, #tpu.memory_space<vmem>>, vector<8x32x4xbf16>
    "tpu.trace_start"() <{level = 10 : i32, message = "hnc,hcd->hnd"}> : () -> ()
    %cst_14 = arith.constant dense<0.000000e+00> : vector<8x16x4xf32>
    %15 = tpu.matmul %7, %14, %cst_14 {dimension_numbers = #tpu.dot_dimension_numbers<[2], [1], [1], [2], [0, 0, 0, 1, 1, 2], [0], [0]>} : vector<8x16x32xbf16>, vector<8x32x4xbf16>, vector<8x16x4xf32> -> vector<8x16x4xf32>
    "tpu.trace_stop"() : () -> ()
    %c0_15 = arith.constant 0 : index
    %c0_16 = arith.constant 0 : index
    %c0_17 = arith.constant 0 : index
    %16 = vector.load %arg6[%c0_15, %c0_16, %c0_17] : memref<8x32x4xbf16, #tpu.memory_space<vmem>>, vector<8x32x4xbf16>
    "tpu.trace_start"() <{level = 10 : i32, message = "hnc,hcd->hnd"}> : () -> ()
    %cst_18 = arith.constant dense<0.000000e+00> : vector<8x16x4xf32>
    %17 = tpu.matmul %11, %16, %cst_18 {dimension_numbers = #tpu.dot_dimension_numbers<[2], [1], [1], [2], [0, 0, 0, 1, 1, 2], [0], [0]>} : vector<8x16x32xbf16>, vector<8x32x4xbf16>, vector<8x16x4xf32> -> vector<8x16x4xf32>
    "tpu.trace_stop"() : () -> ()
    %18 = arith.truncf %13 : vector<8x8x4xf32> to vector<8x8x4xbf16>
    %19 = arith.truncf %15 : vector<8x16x4xf32> to vector<8x16x4xbf16>
    "tpu.trace_start"() <{level = 10 : i32, message = "hqd,hkd->hqk"}> : () -> ()
    %cst_19 = arith.constant dense<0.000000e+00> : vector<8x8x16xf32>
    %20 = tpu.matmul %18, %19, %cst_19 {dimension_numbers = #tpu.dot_dimension_numbers<[2], [2], [1], [1], [0, 0, 0, 1, 1, 1], [0], [0]>} : vector<8x8x4xbf16>, vector<8x16x4xbf16>, vector<8x8x16xf32> -> vector<8x8x16xf32>
    "tpu.trace_stop"() : () -> ()
    %cst_20 = arith.constant dense<0xFF800000> : vector<8x8xf32>
    %21 = vector.multi_reduction <maximumf>, %20, %cst_20 [2] : vector<8x8x16xf32> to vector<8x8xf32>
    %22 = vector.shape_cast %21 : vector<8x8xf32> to vector<8x8x1xf32>
    %23 = vector.broadcast %22 : vector<8x8x1xf32> to vector<8x8x16xf32>
    %24 = arith.subf %20, %23 : vector<8x8x16xf32>
    %25 = math.exp %24 : vector<8x8x16xf32>
    %cst_21 = arith.constant dense<0.000000e+00> : vector<8x8xf32>
    %26 = vector.multi_reduction <add>, %25, %cst_21 [2] : vector<8x8x16xf32> to vector<8x8xf32>
    %27 = vector.shape_cast %26 : vector<8x8xf32> to vector<8x8x1xf32>
    %28 = tpu.reciprocal %27 {approx = true} : vector<8x8x1xf32> -> vector<8x8x1xf32>
    %29 = vector.broadcast %28 : vector<8x8x1xf32> to vector<8x8x16xf32>
    %30 = arith.mulf %25, %29 : vector<8x8x16xf32>
    %31 = arith.truncf %30 : vector<8x8x16xf32> to vector<8x8x16xbf16>
    %32 = arith.truncf %17 : vector<8x16x4xf32> to vector<8x16x4xbf16>
    "tpu.trace_start"() <{level = 10 : i32, message = "hqk,hkd->hqd"}> : () -> ()
    %cst_22 = arith.constant dense<0.000000e+00> : vector<8x8x4xf32>
    %33 = tpu.matmul %31, %32, %cst_22 {dimension_numbers = #tpu.dot_dimension_numbers<[2], [1], [1], [2], [0, 0, 0, 1, 1, 2], [0], [0]>} : vector<8x8x16xbf16>, vector<8x16x4xbf16>, vector<8x8x4xf32> -> vector<8x8x4xf32>
    "tpu.trace_stop"() : () -> ()
    %34 = arith.truncf %33 : vector<8x8x4xf32> to vector<8x8x4xbf16>
    %c0_23 = arith.constant 0 : index
    %c0_24 = arith.constant 0 : index
    %c0_25 = arith.constant 0 : index
    %35 = vector.load %arg7[%c0_23, %c0_24, %c0_25] : memref<8x4x32xbf16, #tpu.memory_space<vmem>>, vector<8x4x32xbf16>
    "tpu.trace_start"() <{level = 10 : i32, message = "hqd,hdc->hqc"}> : () -> ()
    %cst_26 = arith.constant dense<0.000000e+00> : vector<8x8x32xf32>
    %36 = tpu.matmul %34, %35, %cst_26 {dimension_numbers = #tpu.dot_dimension_numbers<[2], [1], [1], [2], [0, 0, 0, 1, 1, 2], [0], [0]>} : vector<8x8x4xbf16>, vector<8x4x32xbf16>, vector<8x8x32xf32> -> vector<8x8x32xf32>
    "tpu.trace_stop"() : () -> ()
    %cst_27 = arith.constant dense<0.000000e+00> : vector<8x32xf32>
    %37 = vector.multi_reduction <add>, %36, %cst_27 [0] : vector<8x8x32xf32> to vector<8x32xf32>
    %c0_28 = arith.constant 0 : index
    %c0_29 = arith.constant 0 : index
    %38 = vector.load %arg8[%c0_28, %c0_29] : memref<1x32xf32, #tpu.memory_space<vmem>>, vector<1x32xf32>
    %39 = vector.broadcast %38 : vector<1x32xf32> to vector<8x32xf32>
    %40 = arith.addf %37, %39 : vector<8x32xf32>
    %c0_30 = arith.constant 0 : index
    %c0_31 = arith.constant 0 : index
    %c0_32 = arith.constant 0 : index
    %41 = vector.load %arg9[%c0_30, %c0_31, %c0_32] : memref<1x8x32xf32, #tpu.memory_space<vmem>>, vector<1x8x32xf32>
    %42 = vector.shape_cast %41 : vector<1x8x32xf32> to vector<8x32xf32>
    %43 = vector.shape_cast %40 : vector<8x32xf32> to vector<1x8x32xf32>
    tpu.vector_store %arg9[%c0_30, %c0_31, %c0_32], %43 {strides = array<i32>} : memref<1x8x32xf32, #tpu.memory_space<vmem>>, vector<1x8x32xf32>,
    return
  }
  func.func @transform_0(%arg0: i32) -> (i32, i32, i32) {
    %c0_i32 = arith.constant 0 : i32
    %c0_i32_0 = arith.constant 0 : i32
    %c0_i32_1 = arith.constant 0 : i32
    return %arg0, %c0_i32, %c0_i32_0 : i32, i32, i32
  }
  func.func @transform_1(%arg0: i32) -> (i32, i32, i32) {
    %c0_i32 = arith.constant 0 : i32
    %c0_i32_0 = arith.constant 0 : i32
    %c0_i32_1 = arith.constant 0 : i32
    return %arg0, %c0_i32, %c0_i32_0 : i32, i32, i32
  }
  func.func @transform_2(%arg0: i32) -> (i32, i32, i32) {
    %c0_i32 = arith.constant 0 : i32
    %c0_i32_0 = arith.constant 0 : i32
    %c0_i32_1 = arith.constant 0 : i32
    return %arg0, %c0_i32, %c0_i32_0 : i32, i32, i32
  }
  func.func @transform_3(%arg0: i32) -> (i32, i32, i32) {
    %c0_i32 = arith.constant 0 : i32
    %c0_i32_0 = arith.constant 0 : i32
    %c0_i32_1 = arith.constant 0 : i32
    %c0_i32_2 = arith.constant 0 : i32
    return %c0_i32, %c0_i32_0, %c0_i32_1 : i32, i32, i32
  }
  func.func @transform_4(%arg0: i32) -> (i32, i32, i32) {
    %c0_i32 = arith.constant 0 : i32
    %c0_i32_0 = arith.constant 0 : i32
    %c0_i32_1 = arith.constant 0 : i32
    %c0_i32_2 = arith.constant 0 : i32
    return %c0_i32, %c0_i32_0, %c0_i32_1 : i32, i32, i32
  }
  func.func @transform_5(%arg0: i32) -> (i32, i32, i32) {
    %c0_i32 = arith.constant 0 : i32
    %c0_i32_0 = arith.constant 0 : i32
    %c0_i32_1 = arith.constant 0 : i32
    %c0_i32_2 = arith.constant 0 : i32
    return %c0_i32, %c0_i32_0, %c0_i32_1 : i32, i32, i32
  }
  func.func @transform_6(%arg0: i32) -> (i32, i32, i32) {
    %c0_i32 = arith.constant 0 : i32
    %c0_i32_0 = arith.constant 0 : i32
    %c0_i32_1 = arith.constant 0 : i32
    %c0_i32_2 = arith.constant 0 : i32
    return %c0_i32, %c0_i32_0, %c0_i32_1 : i32, i32, i32
  }
  func.func @transform_7(%arg0: i32) -> (i32, i32) {
    %c0_i32 = arith.constant 0 : i32
    %c0_i32_0 = arith.constant 0 : i32
    %c0_i32_1 = arith.constant 0 : i32
    return %c0_i32, %c0_i32_0 : i32, i32
  }
  func.func @transform_8(%arg0: i32) -> (i32, i32, i32) {
    %c0_i32 = arith.constant 0 : i32
    %c0_i32_0 = arith.constant 0 : i32
    %c0_i32_1 = arith.constant 0 : i32
    return %arg0, %c0_i32, %c0_i32_0 : i32, i32, i32
  }
}

</mosaic_0001>

<bundles_post_ra>
// kernel: tpu_custom_call.1
= control target key start
LH: loop header
LB: loop body
LE: loop exit
PB: predicated region body
PF: predicated region fallthrough
CT: control target
= control target key end

     0   :  { %13 = vsyncpa [#allocation3], 0  ;;  %s4493_s0 = inlined_call_operand.vmem [shape: f32[2,8,32], index: 0, kind: input, shape index: {}]   ;;  %s4494_s1 = inlined_call_operand.vmem [shape: f32[2,16,32], index: 1, kind: input, shape index: {}]   ;;  %s4495_s2 = inlined_call_operand.vmem [shape: f32[2,16,32], index: 2, kind: input, shape index: {}]   ;;  %s4496_s3 = inlined_call_operand.vmem [shape: bf16[8,32,4], index: 3, kind: input, shape index: {}]   ;;  %s4497_s4 = inlined_call_operand.vmem [shape: bf16[8,32,4], index: 4, kind: input, shape index: {}]   ;;  %s4498_s5 = inlined_call_operand.vmem [shape: bf16[8,32,4], index: 5, kind: input, shape index: {}]   ;;  %s4499_s6 = inlined_call_operand.vmem [shape: bf16[8,4,32], index: 6, kind: input, shape index: {}]   ;;  %s4500_s7 = inlined_call_operand.vmem [shape: f32[1,32], index: 7, kind: input, shape index: {}]   ;;  %s4501_s8 = inlined_call_operand.hbm [shape: f32[2,8,32], index: 8, kind: output, shape index: {}]  }
   0x1   :  { %15 = vsyncpa [#allocation3 + $0x1], 0  ;;  %s3860_s27 = smov 0   ;;  %s3862_s28 = smov 0  }
   0x2   :  { %s3864_s29 = smov 0   ;;  %s3866_s30 = smov 0  }
   0x3 LB: > { %s3881_s9 = sadd.s32 4294967295, %s3810_s30   ;;  %s3060_s10 = sadd.s32 4294967294, %s3810_s30   ;;  %s3810_s30 = sphi %s3866_s30, %s4507_s30   ;;  %s3806_s29 = sphi %s3864_s29, %s4506_s29   ;;  %s3802_s28 = sphi %s3862_s28, %s4505_s28   ;;  %s3798_s27 = sphi %s3860_s27, %s4504_s27  }
   0x4   : > { %s3885_s11 = sadd.s32 1, %s3810_s30   ;;  %s211_s12 = sadd.s32 1, %s3806_s29 }
   0x5   : > { %s208_s13 = ssub.s32 %s3810_s30, %s3885_s11  ;;  %p221_p0 = scmp.ne.s32.totalorder %s3806_s29, %s3802_s28 }
   0x6   : > { %p209_p1 = scmp.eq.s32.totalorder %s208_s13, 0  ;;  %p222_p2 = scmp.eq.s32.totalorder %s3881_s9, 1 }
   0x7   : > { %p227_p3 = scmp.ne.s32.totalorder %s3802_s28, %s3798_s27  ;;  %p228_p4 = scmp.eq.s32.totalorder %s3060_s10, 1 }
   0x8   : > { %s3896_s14 = scalar_select %p209_p1, %s3806_s29, %s211_s12  }
   0x9   : > { %p3898_p5 = por %p222_p2, %p221_p0  ;;  %p3902_p6 = por %p228_p4, %p227_p3 }
   0xa   : > { %p3063_p7 = scmp.ge.s32.totalorder %s3810_s30, 1  ;;  %p284_p8 = scmp.lt.s32.totalorder %s3810_s30, 3 }
   0xc   : > { %p285_p9 = pnand %p3063_p7, %p284_p8 }
   0xd   : > { %p327_p10 = scmp.lt.s32.totalorder (!%p285_p9), %s3881_s9, 1  ;;  %s324_s21 = sand.u32 (!%p285_p9), 1, %s3802_s28  }
   0xe   : > { %288 = sbr.rel (%p285_p9) target bundleno = 1208 (0x4b8), region = 52  ;;  %s3168_s23 = sshll.u32 (!%p285_p9), %s3881_s9, 7 }
  0x13   : > { %v3670_v0 = vld [vmem:[%s4496_s3 + $0x8] sm:$0xff]   ;;  %v3812_v1 = vmov 0.0   ;;  %v3671_v2 = vld [vmem:[%s4496_s3 + $0x18] sm:$0xff]   ;;  %v3672_v3 = vld [vmem:[%s4496_s3] sm:$0xff]   ;;  %vm3813_vm0 = vmmov 0   ;;  %s3930_s25 = scalar_select %p327_p10, %s3881_s9, 1 }
  0x14   : > { %3293 = vmatprep.subr.bf16.mxu0 %v3812_v1  ;;  %3301 = vmatprep.subr.bf16.mxu1 %v3812_v1  ;;  %v3673_v4 = vld [vmem:[%s4496_s3 + $0x10] sm:$0xff]   ;;  %v3674_v5 = vld [vmem:[%s4496_s3 + $0x28] sm:$0xff]   ;;  %v3675_v6 = vld [vmem:[%s4496_s3 + $0x38] sm:$0xff]   ;;  %vm394_vm1 = vcmask 261120   ;;  %vm1736_vm2 = vcmask 31744   ;;  %vm2105_vm3 = vcmask 130048  }
  0x15   : > { %3294 = vmatpush3.bf16.msra.mxu0 %v3670_v0  ;;  %3297 = vmatprep.mubr.msk.bf16.mxu0 %vm3813_vm0, %v3812_v1  ;;  %s3065_s26 = sshll.u32 %s3930_s25, 3  ;;  %v3676_v9 = vld [vmem:[%s4496_s3 + $0x20] sm:$0xff]   ;;  %v3677_v10 = vld [vmem:[%s4496_s3 + $0x30] sm:$0xff]   ;;  %v3678_v11 = vld [vmem:[%s4496_s3 + $0x48] sm:$0xff]   ;;  %s3171_s17 = sshll.u32 %s3930_s25, 4  ;;  %vm2573_vm4 = vcmask 1041408  }
  0x16   : > { %3302 = vmatpush3.bf16.msra.mxu1 %v3671_v2  ;;  %3295 = vmatprep.subr.bf16.mxu0 %v3812_v1  ;;  %s330_s18 = scalar_lea.vmem %s4493_s0, %s3065_s26  ;;  %v3679_v12 = vld [vmem:[%s4496_s3 + $0x58] sm:$0xff]   ;;  %v3680_v13 = vld [vmem:[%s4496_s3 + $0x40] sm:$0xff]   ;;  %v3681_v14 = vld [vmem:[%s4496_s3 + $0x50] sm:$0xff]   ;;  %s335_s22 = scalar_lea.vmem %s4494_s1, %s3171_s17 }
  0x17   : > { %3303 = vmatprep.subr.bf16.mxu1 %v3812_v1  ;;  %3305 = vmatprep.mubr.msk.bf16.mxu1 %vm3813_vm0, %v3812_v1  ;;  %v342_v7 = vld [vmem:[%s330_s18] sm:$0xff]  ;;  %v3682_v15 = vld [vmem:[%s4496_s3 + $0x68] sm:$0xff]   ;;  %v3683_v16 = vld [vmem:[%s4496_s3 + $0x78] sm:$0xff]   ;;  %s340_s13 = scalar_lea.vmem %s4495_s2, %s3171_s17  ;;  %s3064_s25 = sshll.u32 %s324_s21, 3 }
  0x18   : > { %v343_v8 = vpack.c.bf16 %v342_v7, %v342_v7  ;;  %v3684_v17 = vld [vmem:[%s4496_s3 + $0x60] sm:$0xff]   ;;  %v3685_v18 = vld [vmem:[%s4496_s3 + $0x70] sm:$0xff]   ;;  %v3686_v19 = vld [vmem:[%s4497_s4 + $0x8] sm:$0xff]   ;;  %s326_s24 = scalar_lea.vmem [#allocation2], %s3064_s25  ;;  %s2964_s18 = scalar_lea.sflag [#allocation3], %s324_s21 }
  0x19   : > { %3296 = vmatpush3.bf16.msra.mxu0 %v3672_v3  ;;  %v3687_v20 = vld [vmem:[%s4497_s4 + $0x18] sm:$0xff]   ;;  %v3688_v21 = vld [vmem:[%s4497_s4] sm:$0xff]   ;;  %v3689_v22 = vld [vmem:[%s4497_s4 + $0x10] sm:$0xff]   ;;  %s2977_s26 = sshll.u32 %s326_s24, 4  ;;  %s3814_s9 = smov [#allocation2]   ;;  %s2978_s26 = int_to_ptr.vmem [resolvable:$true] %s2977_s26 }
  0x1a   : > { %3304 = vmatpush3.bf16.msra.mxu1 %v3673_v4  ;;  %3309 = vmatprep.subr.bf16.mxu0 %v3812_v1  ;;  %v344_v23 = vld [vmem:[%s335_s22] sm:$0xff]  ;;  %v345_v24 = vld [vmem:[%s335_s22 + $0x8] sm:$0xff]  ;;  %v3691_v26 = vld [vmem:[%s4497_s4 + $0x38] sm:$0xff]   ;;  %s3750_s19 = scalar_lea.vmem %s2978_s26, 128  ;;  %s3754_s20 = sshll.u32 %s3814_s9, 4  ;;  %s3755_s20 = int_to_ptr.vmem [resolvable:$false] %s3754_s20 }
  0x1b   : > { %3317 = vmatprep.subr.bf16.mxu1 %v3812_v1  ;;  %v3690_v25 = vld [vmem:[%s4497_s4 + $0x28] sm:$0xff]   ;;  %v346_v27 = vpack.c.bf16 %v345_v24, %v344_v23  ;;  %v3692_v28 = vld [vmem:[%s4497_s4 + $0x20] sm:$0xff]   ;;  %v3693_v29 = vld [vmem:[%s4497_s4 + $0x30] sm:$0xff]   ;;  %p3751_p11 = scmp.ne.s32.totalorder %s2978_s26, %s3750_s19  ;;  %s3756_s25 = scalar_lea.vmem %s3755_s20, 256 }
  0x1c   : > { %3298 = vmatmul.mubr.msk.bf16.vlgmr.msra.gmra.mxu0 %vm394_vm1, %v343_v8  ;;  %v3694_v30 = vld [vmem:[%s4497_s4 + $0x48] sm:$0xff]   ;;  %v3695_v31 = vld [vmem:[%s4497_s4 + $0x58] sm:$0xff]   ;;  %v3696_v32 = vld [vmem:[%s4497_s4 + $0x40] sm:$0xff]   ;;  %p3757_p0 = scmp.lt.s32.totalorder %s2978_s26, %s3755_s20  ;;  %p3758_p1 = scmp.lt.s32.totalorder %s3756_s25, %s3750_s19 }
  0x1d   : > { %3306 = vmatmul.mubr.msk.bf16.vlgmr.msra.gmra.mxu1 %vm394_vm1, %v343_v8  ;;  %3310 = vmatpush3.bf16.msra.mxu0 %v3674_v5  ;;  %v3697_v33 = vld [vmem:[%s4497_s4 + $0x50] sm:$0xff]   ;;  %v3698_v34 = vld [vmem:[%s4497_s4 + $0x68] sm:$0xff]   ;;  %v3699_v35 = vld [vmem:[%s4497_s4 + $0x78] sm:$0xff]   ;;  %p3752_p12 = pnand %p3751_p11, %p3898_p5 }
  0x1e   : > { %3318 = vmatpush3.bf16.msra.mxu1 %v3675_v6  ;;  %3311 = vmatprep.subr.bf16.mxu0 %v3812_v1  ;;  %v3700_v36 = vld [vmem:[%s4497_s4 + $0x60] sm:$0xff]   ;;  %v3701_v37 = vld [vmem:[%s4497_s4 + $0x70] sm:$0xff]   ;;  %v3702_v38 = vld [vmem:[%s4498_s5 + $0x8] sm:$0xff]   ;;  %p3759_p2 = por %p3758_p1, %p3757_p0 }
  0x1f   : > { %3319 = vmatprep.subr.bf16.mxu1 %v3812_v1  ;;  %3313 = vmatprep.mubr.msk.bf16.mxu0 %vm3813_vm0, %v3812_v1  ;;  %v3703_v39 = vld [vmem:[%s4498_s5] sm:$0xff]   ;;  %v3704_v40 = vld [vmem:[%s4498_s5 + $0x18] sm:$0xff]   ;;  %v348_v42 = vld [vmem:[%s340_s13 + $0x8] sm:$0xff]  ;;  %p3753_p13 = pneg %p3752_p12 }
  0x20   : > { %3321 = vmatprep.mubr.msk.bf16.mxu1 %vm3813_vm0, %v3812_v1  ;;  %v347_v41 = vld [vmem:[%s340_s13] sm:$0xff]  ;;  %v3705_v44 = vld [vmem:[%s4498_s5 + $0x10] sm:$0xff]   ;;  %v3706_v45 = vld [vmem:[%s4498_s5 + $0x28] sm:$0xff]   ;;  %s4455_s13 = scalar_lea.hbm %s4501_s8, %s3168_s23 }
  0x21   : > { %3312 = vmatpush3.bf16.msra.mxu0 %v3676_v9  ;;  %v349_v43 = vpack.c.bf16 %v348_v42, %v347_v41  ;;  %v3707_v46 = vld [vmem:[%s4498_s5 + $0x20] sm:$0xff]   ;;  %v3708_v47 = vld [vmem:[%s4498_s5 + $0x38] sm:$0xff]   ;;  %v3709_v48 = vld [vmem:[%s4498_s5 + $0x30] sm:$0xff]   ;;  %p3760_p3 = pnand %p3759_p2, %p3753_p13 }
  0x22   : > { %3320 = vmatpush3.bf16.msra.mxu1 %v3677_v10  ;;  %3325 = vmatprep.subr.bf16.mxu0 %v3812_v1  ;;  %v3710_v49 = vld [vmem:[%s4498_s5 + $0x48] sm:$0xff]   ;;  %v3711_v50 = vld [vmem:[%s4498_s5 + $0x40] sm:$0xff]   ;;  %v3712_v51 = vld [vmem:[%s4498_s5 + $0x58] sm:$0xff]  }
  0x23   : > { %3333 = vmatprep.subr.bf16.mxu1 %v3812_v1  ;;  %v3713_v52 = vld [vmem:[%s4498_s5 + $0x50] sm:$0xff]   ;;  %v3714_v53 = vld [vmem:[%s4498_s5 + $0x68] sm:$0xff]   ;;  %v3715_v54 = vld [vmem:[%s4498_s5 + $0x60] sm:$0xff]  }
  0x24   : > { %3314 = vmatmul.mubr.msk.bf16.vlgmr.msra.gmra.mxu0 %vm394_vm1, %v343_v8  ;;  %v3716_v55 = vld [vmem:[%s4498_s5 + $0x78] sm:$0xff]   ;;  %v3717_v56 = vld [vmem:[%s4498_s5 + $0x70] sm:$0xff]  }
  0x25   : > { %3322 = vmatmul.mubr.msk.bf16.vlgmr.msra.gmra.mxu1 %vm394_vm1, %v343_v8  ;;  %3326 = vmatpush3.bf16.msra.mxu0 %v3678_v11 }
  0x26   : > { %3334 = vmatpush3.bf16.msra.mxu1 %v3679_v12  ;;  %3327 = vmatprep.subr.bf16.mxu0 %v3812_v1 }
  0x27   : > { %3335 = vmatprep.subr.bf16.mxu1 %v3812_v1  ;;  %3329 = vmatprep.mubr.msk.bf16.mxu0 %vm3813_vm0, %v3812_v1 }
  0x28   : > { %3337 = vmatprep.mubr.msk.bf16.mxu1 %vm3813_vm0, %v3812_v1 }
  0x29   : > { %3328 = vmatpush3.bf16.msra.mxu0 %v3680_v13 }
  0x2a   : > { %3336 = vmatpush3.bf16.msra.mxu1 %v3681_v14  ;;  %3341 = vmatprep.subr.bf16.mxu0 %v3812_v1 }
  0x2b   : > { %3349 = vmatprep.subr.bf16.mxu1 %v3812_v1 }
  0x2c   : > { %3330 = vmatmul.mubr.msk.bf16.vlgmr.msra.gmra.mxu0 %vm394_vm1, %v343_v8 }
  0x2d   : > { %3338 = vmatmul.mubr.msk.bf16.vlgmr.msra.gmra.mxu1 %vm394_vm1, %v343_v8  ;;  %3342 = vmatpush3.bf16.msra.mxu0 %v3682_v15 }
  0x2e   : > { %3350 = vmatpush3.bf16.msra.mxu1 %v3683_v16  ;;  %3343 = vmatprep.subr.bf16.mxu0 %v3812_v1 }
  0x2f   : > { %3351 = vmatprep.subr.bf16.mxu1 %v3812_v1  ;;  %3345 = vmatprep.mubr.msk.bf16.mxu0 %vm3813_vm0, %v3812_v1 }
  0x30   : > { %3353 = vmatprep.mubr.msk.bf16.mxu1 %vm3813_vm0, %v3812_v1 }
  0x31   : > { %3344 = vmatpush3.bf16.msra.mxu0 %v3684_v17 }
  0x32   : > { %3352 = vmatpush3.bf16.msra.mxu1 %v3685_v18  ;;  %3357 = vmatprep.subr.bf16.mxu0 %v3812_v1 }
  0x33   : > { %3365 = vmatprep.subr.bf16.mxu1 %v3812_v1 }
  0x34   : > { %3346 = vmatmul.mubr.msk.bf16.vlgmr.msra.gmra.mxu0 %vm394_vm1, %v343_v8 }
  0x35   : > { %3354 = vmatmul.mubr.msk.bf16.vlgmr.msra.gmra.mxu1 %vm394_vm1, %v343_v8  ;;  %3358 = vmatpush3.bf16.msra.mxu0 %v3686_v19 }
  0x36   : > { %3366 = vmatpush3.bf16.msra.mxu1 %v3687_v20  ;;  %3359 = vmatprep.subr.bf16.mxu0 %v3812_v1 }
  0x37   : > { %3367 = vmatprep.subr.bf16.mxu1 %v3812_v1  ;;  %3361 = vmatprep.mubr.msk.bf16.mxu0 %vm3813_vm0, %v3812_v1 }
  0x38   : > { %3369 = vmatprep.mubr.msk.bf16.mxu1 %vm3813_vm0, %v3812_v1 }
  0x39   : > { %3360 = vmatpush3.bf16.msra.mxu0 %v3688_v21 }
  0x3a   : > { %3368 = vmatpush3.bf16.msra.mxu1 %v3689_v22  ;;  %3373 = vmatprep.subr.bf16.mxu0 %v3812_v1 }
  0x3b   : > { %3381 = vmatprep.subr.bf16.mxu1 %v3812_v1 }
  0x3c   : > { %3362 = vmatmul.mubr.msk.bf16.vlgmr.msra.gmra.mxu0 %vm394_vm1, %v346_v27 }
  0x3d   : > { %3370 = vmatmul.mubr.msk.bf16.vlgmr.msra.gmra.mxu1 %vm394_vm1, %v346_v27  ;;  %3374 = vmatpush3.bf16.msra.mxu0 %v3690_v25 }
  0x3e   : > { %3382 = vmatpush3.bf16.msra.mxu1 %v3691_v26  ;;  %3375 = vmatprep.subr.bf16.mxu0 %v3812_v1 }
  0x3f   : > { %3383 = vmatprep.subr.bf16.mxu1 %v3812_v1  ;;  %3377 = vmatprep.mubr.msk.bf16.mxu0 %vm3813_vm0, %v3812_v1 }
  0x40   : > { %3385 = vmatprep.mubr.msk.bf16.mxu1 %vm3813_vm0, %v3812_v1 }
  0x41   : > { %3376 = vmatpush3.bf16.msra.mxu0 %v3692_v28 }
  0x42   : > { %3384 = vmatpush3.bf16.msra.mxu1 %v3693_v29  ;;  %3389 = vmatprep.subr.bf16.mxu0 %v3812_v1 }
  0x43   : > { %3397 = vmatprep.subr.bf16.mxu1 %v3812_v1 }
  0x44   : > { %3378 = vmatmul.mubr.msk.bf16.vlgmr.msra.gmra.mxu0 %vm394_vm1, %v346_v27 }
  0x45   : > { %3386 = vmatmul.mubr.msk.bf16.vlgmr.msra.gmra.mxu1 %vm394_vm1, %v346_v27  ;;  %3390 = vmatpush3.bf16.msra.mxu0 %v3694_v30 }
  0x46   : > { %3398 = vmatpush3.bf16.msra.mxu1 %v3695_v31  ;;  %3391 = vmatprep.subr.bf16.mxu0 %v3812_v1 }
  0x47   : > { %3399 = vmatprep.subr.bf16.mxu1 %v3812_v1  ;;  %3393 = vmatprep.mubr.msk.bf16.mxu0 %vm3813_vm0, %v3812_v1 }
  0x48   : > { %3401 = vmatprep.mubr.msk.bf16.mxu1 %vm3813_vm0, %v3812_v1 }
  0x49   : > { %3392 = vmatpush3.bf16.msra.mxu0 %v3696_v32 }
  0x4a   : > { %3400 = vmatpush3.bf16.msra.mxu1 %v3697_v33  ;;  %3405 = vmatprep.subr.bf16.mxu0 %v3812_v1 }
  0x4b   : > { %3413 = vmatprep.subr.bf16.mxu1 %v3812_v1 }
  0x4c   : > { %3394 = vmatmul.mubr.msk.bf16.vlgmr.msra.gmra.mxu0 %vm394_vm1, %v346_v27 }
  0x4d   : > { %3402 = vmatmul.mubr.msk.bf16.vlgmr.msra.gmra.mxu1 %vm394_vm1, %v346_v27  ;;  %3406 = vmatpush3.bf16.msra.mxu0 %v3698_v34 }
  0x4e   : > { %3414 = vmatpush3.bf16.msra.mxu1 %v3699_v35  ;;  %3407 = vmatprep.subr.bf16.mxu0 %v3812_v1 }
  0x4f   : > { %3415 = vmatprep.subr.bf16.mxu1 %v3812_v1  ;;  %3409 = vmatprep.mubr.msk.bf16.mxu0 %vm3813_vm0, %v3812_v1 }
  0x50   : > { %3417 = vmatprep.mubr.msk.bf16.mxu1 %vm3813_vm0, %v3812_v1 }
  0x51   : > { %3408 = vmatpush3.bf16.msra.mxu0 %v3700_v36 }
  0x52   : > { %3416 = vmatpush3.bf16.msra.mxu1 %v3701_v37  ;;  %3421 = vmatprep.subr.bf16.mxu0 %v3812_v1 }
  0x53   : > { %3429 = vmatprep.subr.bf16.mxu1 %v3812_v1 }
  0x54   : > { %3410 = vmatmul.mubr.msk.bf16.vlgmr.msra.gmra.mxu0 %vm394_vm1, %v346_v27 }
  0x55   : > { %3418 = vmatmul.mubr.msk.bf16.vlgmr.msra.gmra.mxu1 %vm394_vm1, %v346_v27  ;;  %3425 = vmatprep.mubr.msk.bf16.mxu0 %vm3813_vm0, %v3812_v1 }
  0x56   : > { %3433 = vmatprep.mubr.msk.bf16.mxu1 %vm3813_vm0, %v3812_v1  ;;  %3422 = vmatpush3.bf16.msra.mxu0 %v3702_v38 }
  0x57   : > { %3423 = vmatprep.subr.bf16.mxu0 %v3812_v1  ;;  %3430 = vmatpush3.bf16.msra.mxu1 %v3704_v40 }
  0x58   : > { %3431 = vmatprep.subr.bf16.mxu1 %v3812_v1 }
  0x5a   : > { %3424 = vmatpush3.bf16.msra.mxu0 %v3703_v39 }
  0x5b   : > { %3437 = vmatprep.subr.bf16.mxu0 %v3812_v1  ;;  %3432 = vmatpush3.bf16.msra.mxu1 %v3705_v44 }
  0x5c   : > { %3445 = vmatprep.subr.bf16.mxu1 %v3812_v1 }
  0x5d   : > { %3426 = vmatmul.mubr.msk.bf16.vlgmr.msra.gmra.mxu0 %vm394_vm1, %v349_v43 }
  0x5e   : > { %3438 = vmatpush3.bf16.msra.mxu0 %v3706_v45  ;;  %3441 = vmatprep.mubr.msk.bf16.mxu0 %vm3813_vm0, %v3812_v1 }
  0x5f   : > { %3439 = vmatprep.subr.bf16.mxu0 %v3812_v1  ;;  %3434 = vmatmul.mubr.msk.bf16.vlgmr.msra.gmra.mxu1 %vm394_vm1, %v349_v43 }
  0x60   : > { %3446 = vmatpush3.bf16.msra.mxu1 %v3708_v47  ;;  %3449 = vmatprep.mubr.msk.bf16.mxu1 %vm3813_vm0, %v3812_v1 }
  0x61   : > { %3447 = vmatprep.subr.bf16.mxu1 %v3812_v1 }
  0x62   : > { %3440 = vmatpush3.bf16.msra.mxu0 %v3707_v46 }
  0x63   : > { %3453 = vmatprep.subr.bf16.mxu0 %v3812_v1 }
  0x64   : > { %3448 = vmatpush3.bf16.msra.mxu1 %v3709_v48 }
  0x65   : > { %3442 = vmatmul.mubr.msk.bf16.vlgmr.msra.gmra.mxu0 %vm394_vm1, %v349_v43  ;;  %3461 = vmatprep.subr.bf16.mxu1 %v3812_v1 }
  0x66   : > { %3454 = vmatpush3.bf16.msra.mxu0 %v3710_v49  ;;  %3457 = vmatprep.mubr.msk.bf16.mxu0 %vm3813_vm0, %v3812_v1 }
  0x67   : > { %3455 = vmatprep.subr.bf16.mxu0 %v3812_v1  ;;  %3450 = vmatmul.mubr.msk.bf16.vlgmr.msra.gmra.mxu1 %vm394_vm1, %v349_v43 }
  0x68   : > { %3462 = vmatpush3.bf16.msra.mxu1 %v3712_v51  ;;  %3465 = vmatprep.mubr.msk.bf16.mxu1 %vm3813_vm0, %v3812_v1 }
  0x69   : > { %3463 = vmatprep.subr.bf16.mxu1 %v3812_v1 }
  0x6a   : > { %3456 = vmatpush3.bf16.msra.mxu0 %v3711_v50 }
  0x6b   : > { %3469 = vmatprep.subr.bf16.mxu0 %v3812_v1 }
  0x6c   : > { %3464 = vmatpush3.bf16.msra.mxu1 %v3713_v52 }
  0x6d   : > { %3458 = vmatmul.mubr.msk.bf16.vlgmr.msra.gmra.mxu0 %vm394_vm1, %v349_v43  ;;  %3477 = vmatprep.subr.bf16.mxu1 %v3812_v1 }
  0x6e   : > { %3470 = vmatpush3.bf16.msra.mxu0 %v3714_v53  ;;  %3473 = vmatprep.mubr.msk.bf16.mxu0 %vm3813_vm0, %v3812_v1 }
  0x6f   : > { %3471 = vmatprep.subr.bf16.mxu0 %v3812_v1  ;;  %3466 = vmatmul.mubr.msk.bf16.vlgmr.msra.gmra.mxu1 %vm394_vm1, %v349_v43 }
  0x70   : > { %3478 = vmatpush3.bf16.msra.mxu1 %v3716_v55  ;;  %3481 = vmatprep.mubr.msk.bf16.mxu1 %vm3813_vm0, %v3812_v1 }
  0x71   : > { %3479 = vmatprep.subr.bf16.mxu1 %v3812_v1 }
  0x72   : > { %3472 = vmatpush3.bf16.msra.mxu0 %v3715_v54 }
  0x73   : > { %3485 = vmatprep.subr.bf16.mxu0 %v3812_v1 }
  0x74   : > { %3480 = vmatpush3.bf16.msra.mxu1 %v3717_v56 }
  0x75   : > { %3474 = vmatmul.mubr.msk.bf16.vlgmr.msra.gmra.mxu0 %vm394_vm1, %v349_v43  ;;  %3491 = vmatprep.subr.bf16.mxu1 %v3812_v1 }
  0x76   : > { %3487 = vmatprep.mubr.msk.bf16.mxu0 %vm3813_vm0, %v3812_v1 }
  0x77   : > { %3482 = vmatmul.mubr.msk.bf16.vlgmr.msra.gmra.mxu1 %vm394_vm1, %v349_v43 }
  0x78   : > { %3493 = vmatprep.mubr.msk.bf16.mxu1 %vm3813_vm0, %v3812_v1 }
  0xdc   : > { %v4197_v57 = vpop.f32.mrf.mxu0 }
  0xdd   : > { %v4199_v58 = vpop.f32.mrf.mxu1  ;;  %v1720_v44 = vpack.c.bf16 %v4197_v57, %v4197_v57 }
  0xde   : > { %v3299_v59 = vpop.f32.mrf.mxu0  ;;  %v1721_v45 = vpack.c.bf16 %v4199_v58, %v4199_v58 }
  0xdf   : > { %v3307_v60 = vpop.f32.mrf.mxu1 }
  0xe0   : > { %v435_v61 = vpop.f32.mrf.mxu0 }
  0xe1   : > { %v487_v62 = vpop.f32.mrf.mxu1 }
  0xe2   : > { %v3300_v63 = vpop.f32.mrf.mxu0 }
  0xe3   : > { %v3308_v0 = vpop.f32.mrf.mxu1 }
  0xe4   : > { %v4201_v2 = vpop.f32.mrf.mxu0 }
  0xe5   : > { %v4203_v3 = vpop.f32.mrf.mxu1  ;;  %v1722_v58 = vpack.c.bf16 %v4201_v2, %v4201_v2 }
  0xe6   : > { %v3315_v4 = vpop.f32.mrf.mxu0  ;;  %v1723_v59 = vpack.c.bf16 %v4203_v3, %v4203_v3 }
  0xe7   : > { %v3323_v5 = vpop.f32.mrf.mxu1 }
  0xe8   : > { %v539_v6 = vpop.f32.mrf.mxu0 }
  0xe9   : > { %v591_v7 = vpop.f32.mrf.mxu1 }
  0xea   : > { %v3316_v8 = vpop.f32.mrf.mxu0 }
  0xeb   : > { %v3324_v9 = vpop.f32.mrf.mxu1 }
  0xec   : > { %v4205_v10 = vpop.f32.mrf.mxu0 }
  0xed   : > { %v4207_v11 = vpop.f32.mrf.mxu1  ;;  %v1724_v9 = vpack.c.bf16 %v4205_v10, %v4205_v10 }
  0xee   : > { %v3331_v12 = vpop.f32.mrf.mxu0 }
  0xef   : > { %v3339_v13 = vpop.f32.mrf.mxu1  ;;  %v1725_v12 = vpack.c.bf16 %v4207_v11, %v4207_v11 }
  0xf0   : > { %v643_v14 = vpop.f32.mrf.mxu0 }
  0xf1   : > { %v695_v15 = vpop.f32.mrf.mxu1 }
  0xf2   : > { %v3332_v16 = vpop.f32.mrf.mxu0 }
  0xf3   : > { %v3340_v17 = vpop.f32.mrf.mxu1 }
  0xf4   : > { %v4209_v18 = vpop.f32.mrf.mxu0 }
  0xf5   : > { %v4211_v19 = vpop.f32.mrf.mxu1  ;;  %v1726_v10 = vpack.c.bf16 %v4209_v18, %v4209_v18 }
  0xf6   : > { %v3347_v20 = vpop.f32.mrf.mxu0  ;;  %v1727_v11 = vpack.c.bf16 %v4211_v19, %v4211_v19 }
  0xf7   : > { %v3355_v21 = vpop.f32.mrf.mxu1 }
  0xf8   : > { %v747_v22 = vpop.f32.mrf.mxu0 }
  0xf9   : > { %v799_v23 = vpop.f32.mrf.mxu1 }
  0xfa   : > { %v3348_v24 = vpop.f32.mrf.mxu0 }
  0xfb   : > { %v3356_v25 = vpop.f32.mrf.mxu1 }
  0xfc   : > { %v883_v26 = vpop.f32.mrf.mxu0 }
  0xfd   : > { %v936_v27 = vpop.f32.mrf.mxu1 }
  0xfe   : > { %v3363_v28 = vpop.f32.mrf.mxu0 }
  0xff   : > { %v3371_v29 = vpop.f32.mrf.mxu1 }
 0x100   : > { %v886_v30 = vpop.f32.mrf.mxu0 }
 0x101   : > { %v939_v31 = vpop.f32.mrf.mxu1  ;;  %v1728_v32 = vpack.c.bf16 %v886_v30, %v883_v26 }
 0x102   : > { %v1729_v33 = vpack.c.bf16 %v939_v31, %v936_v27  ;;  %v3364_v34 = vpop.f32.mrf.mxu0 }
 0x103   : > { %v3372_v35 = vpop.f32.mrf.mxu1  ;;  %v1741_v36 = vsel %vm1736_vm2, %v1728_v32, 0 }
 0x104   : > { %v1787_v37 = vsel %vm1736_vm2, %v1729_v33, 0  ;;  %v989_v38 = vpop.f32.mrf.mxu0  ;;  %3486 = vmatpush3.bf16.xpose.msra.mxu0 %v1741_v36 }
 0x105   : > { %v1042_v39 = vpop.f32.mrf.mxu1  ;;  %3492 = vmatpush3.bf16.xpose.msra.mxu1 %v1787_v37  ;;  %3497 = vmatprep.subr.bf16.mxu0 %v3812_v1 }
 0x106   : > { %3503 = vmatprep.subr.bf16.mxu1 %v3812_v1  ;;  %v3379_v40 = vpop.f32.mrf.mxu0 }
 0x107   : > { %v3387_v41 = vpop.f32.mrf.mxu1 }
 0x108   : > { %v992_v42 = vpop.f32.mrf.mxu0 }
 0x109   : > { %v1045_v43 = vpop.f32.mrf.mxu1  ;;  %v1730_v46 = vpack.c.bf16 %v992_v42, %v989_v38 }
 0x10a   : > { %v1731_v47 = vpack.c.bf16 %v1045_v43, %v1042_v39  ;;  %v3380_v48 = vpop.f32.mrf.mxu0 }
 0x10b   : > { %v3388_v49 = vpop.f32.mrf.mxu1  ;;  %v1833_v50 = vsel %vm1736_vm2, %v1730_v46, 0  ;;  %3488 = vmatmul.mubr.msk.bf16.vlgmr.msra.gmra.mxu0 %vm1736_vm2, %v1720_v44 }
 0x10c   : > { %v1879_v51 = vsel %vm1736_vm2, %v1731_v47, 0  ;;  %3494 = vmatmul.mubr.msk.bf16.vlgmr.msra.gmra.mxu1 %vm1736_vm2, %v1721_v45  ;;  %v1095_v52 = vpop.f32.mrf.mxu0  ;;  %3498 = vmatpush3.bf16.xpose.msra.mxu0 %v1833_v50 }
 0x10d   : > { %v1148_v53 = vpop.f32.mrf.mxu1  ;;  %3504 = vmatpush3.bf16.xpose.msra.mxu1 %v1879_v51  ;;  %3499 = vmatprep.mubr.msk.bf16.mxu0 %vm3813_vm0, %v3812_v1 }
 0x10e   : > { %3505 = vmatprep.mubr.msk.bf16.mxu1 %vm3813_vm0, %v3812_v1  ;;  %v3395_v54 = vpop.f32.mrf.mxu0  ;;  %3509 = vmatprep.subr.bf16.mxu0 %v3812_v1 }
 0x10f   : > { %v3403_v55 = vpop.f32.mrf.mxu1  ;;  %3515 = vmatprep.subr.bf16.mxu1 %v3812_v1 }
 0x110   : > { %v1098_v56 = vpop.f32.mrf.mxu0 }
 0x111   : > { %v1151_v57 = vpop.f32.mrf.mxu1  ;;  %v1732_v60 = vpack.c.bf16 %v1098_v56, %v1095_v52 }
 0x112   : > { %v1733_v61 = vpack.c.bf16 %v1151_v57, %v1148_v53  ;;  %v3396_v62 = vpop.f32.mrf.mxu0 }
 0x113   : > { %v3404_v63 = vpop.f32.mrf.mxu1  ;;  %v1925_v0 = vsel %vm1736_vm2, %v1732_v60, 0  ;;  %3500 = vmatmul.mubr.msk.bf16.vlgmr.msra.gmra.mxu0 %vm1736_vm2, %v1722_v58 }
 0x114   : > { %v1971_v4 = vsel %vm1736_vm2, %v1733_v61, 0  ;;  %3506 = vmatmul.mubr.msk.bf16.vlgmr.msra.gmra.mxu1 %vm1736_vm2, %v1723_v59  ;;  %v1201_v5 = vpop.f32.mrf.mxu0  ;;  %3510 = vmatpush3.bf16.xpose.msra.mxu0 %v1925_v0 }
 0x115   : > { %v1254_v6 = vpop.f32.mrf.mxu1  ;;  %3516 = vmatpush3.bf16.xpose.msra.mxu1 %v1971_v4  ;;  %3511 = vmatprep.mubr.msk.bf16.mxu0 %vm3813_vm0, %v3812_v1 }
 0x116   : > { %3517 = vmatprep.mubr.msk.bf16.mxu1 %vm3813_vm0, %v3812_v1  ;;  %v3411_v2 = vpop.f32.mrf.mxu0  ;;  %3521 = vmatprep.subr.bf16.mxu0 %v3812_v1 }
 0x117   : > { %v3419_v3 = vpop.f32.mrf.mxu1  ;;  %3527 = vmatprep.subr.bf16.mxu1 %v3812_v1 }
 0x118   : > { %v1204_v7 = vpop.f32.mrf.mxu0 }
 0x119   : > { %v1257_v8 = vpop.f32.mrf.mxu1  ;;  %v1734_v13 = vpack.c.bf16 %v1204_v7, %v1201_v5 }
 0x11a   : > { %v1735_v14 = vpack.c.bf16 %v1257_v8, %v1254_v6  ;;  %v3412_v15 = vpop.f32.mrf.mxu0 }
 0x11b   : > { %v3420_v16 = vpop.f32.mrf.mxu1  ;;  %v2017_v17 = vsel %vm1736_vm2, %v1734_v13, 0  ;;  %3512 = vmatmul.mubr.msk.bf16.vlgmr.msra.gmra.mxu0 %vm1736_vm2, %v1724_v9 }
 0x11c   : > { %v2063_v20 = vsel %vm1736_vm2, %v1735_v14, 0  ;;  %3518 = vmatmul.mubr.msk.bf16.vlgmr.msra.gmra.mxu1 %vm1736_vm2, %v1725_v12  ;;  %3522 = vmatpush3.bf16.xpose.msra.mxu0 %v2017_v17 }
 0x11d   : > { %3528 = vmatpush3.bf16.xpose.msra.mxu1 %v2063_v20  ;;  %3523 = vmatprep.mubr.msk.bf16.mxu0 %vm3813_vm0, %v3812_v1  ;;  %v1342_v21 = vpop.f32.mrf.mxu0 }
 0x11e   : > { %3529 = vmatprep.mubr.msk.bf16.mxu1 %vm3813_vm0, %v3812_v1  ;;  %3533 = vmatprep.subr.bf16.mxu0 %v3812_v1 }
 0x11f   : > { %3539 = vmatprep.subr.bf16.mxu1 %v3812_v1  ;;  %v3427_v22 = vpop.f32.mrf.mxu0  ;;  %v1395_v24 = vpop.f32.mrf.mxu1 }
 0x121   : > { %v1345_v23 = vpop.f32.mrf.mxu0  ;;  %v3435_v18 = vpop.f32.mrf.mxu1 }
 0x122   : > { %v2202_v25 = vpack.c.bf16 %v1345_v23, %v1342_v21 }
 0x123   : > { %3524 = vmatmul.mubr.msk.bf16.vlgmr.msra.gmra.mxu0 %vm1736_vm2, %v1726_v10  ;;  %v3428_v26 = vpop.f32.mrf.mxu0  ;;  %v1398_v27 = vpop.f32.mrf.mxu1 }
 0x124   : > { %3530 = vmatmul.mubr.msk.bf16.vlgmr.msra.gmra.mxu1 %vm1736_vm2, %v1727_v11  ;;  %3535 = vmatprep.mubr.msk.bf16.mxu0 %vm3813_vm0, %v3812_v1  ;;  %v2203_v28 = vpack.c.bf16 %v1398_v27, %v1395_v24 }
 0x125   : > { %3541 = vmatprep.mubr.msk.bf16.mxu1 %vm3813_vm0, %v3812_v1  ;;  %3534 = vmatpush3.bf16.msra.mxu0 %v2202_v25  ;;  %v4269_v19 = vpop.f32.mrf.mxu0  ;;  %v3436_v29 = vpop.f32.mrf.mxu1 }
 0x126   : > { %3545 = vmatprep.subr.bf16.mxu0 %v3812_v1  ;;  %3540 = vmatpush3.bf16.msra.mxu1 %v2203_v28 }
 0x127   : > { %v3443_v30 = vpop.f32.mrf.mxu0  ;;  %v4274_v32 = vpop.f32.mrf.mxu1  ;;  %3551 = vmatprep.subr.bf16.mxu1 %v3812_v1 }
 0x129   : > { %v4272_v31 = vpop.f32.mrf.mxu0  ;;  %v3451_v35 = vpop.f32.mrf.mxu1 }
 0x12a   : > { %v2204_v33 = vpack.c.bf16 %v4272_v31, %v4269_v19 }
 0x12b   : > { %v3444_v34 = vpop.f32.mrf.mxu0  ;;  %v4279_v36 = vpop.f32.mrf.mxu1 }
 0x12c   : > { %v2205_v38 = vpack.c.bf16 %v4279_v36, %v4274_v32 }
 0x12d   : > { %v4281_v37 = vpop.f32.mrf.mxu0  ;;  %v3452_v39 = vpop.f32.mrf.mxu1 }
 0x12f   : > { %v3459_v40 = vpop.f32.mrf.mxu0  ;;  %v4287_v42 = vpop.f32.mrf.mxu1 }
 0x131   : > { %v4285_v41 = vpop.f32.mrf.mxu0  ;;  %v3467_v45 = vpop.f32.mrf.mxu1 }
 0x132   : > { %v2206_v43 = vpack.c.bf16 %v4285_v41, %v4281_v37 }
 0x133   : > { %v3460_v44 = vpop.f32.mrf.mxu0  ;;  %v4291_v46 = vpop.f32.mrf.mxu1 }
 0x134   : > { %v2207_v48 = vpack.c.bf16 %v4291_v46, %v4287_v42 }
 0x135   : > { %v4293_v47 = vpop.f32.mrf.mxu0  ;;  %v3468_v49 = vpop.f32.mrf.mxu1 }
 0x137   : > { %v3475_v50 = vpop.f32.mrf.mxu0  ;;  %v4299_v52 = vpop.f32.mrf.mxu1 }
 0x139   : > { %v4297_v51 = vpop.f32.mrf.mxu0  ;;  %v3483_v55 = vpop.f32.mrf.mxu1 }
 0x13a   : > { %v2208_v53 = vpack.c.bf16 %v4297_v51, %v4293_v47 }
 0x13b   : > { %v3476_v54 = vpop.f32.mrf.mxu0  ;;  %v4303_v56 = vpop.f32.mrf.mxu1 }
 0x13c   : > { %v2209_v57 = vpack.c.bf16 %v4303_v56, %v4299_v52  ;;  %v2563_v52 = vld [vmem:[%s4499_s6 + $0x2] sm:$0x3] }
 0x13d   : > { %v3484_v58 = vpop.f32.mrf.mxu1  ;;  %v2621_v56 = vsel %vm2573_vm4, %v2563_v52, 0 }
 0x1cb   : > { %v1777_v59 = vpop.f32.mrf.mxu0 }
 0x1cc   : > { %v1823_v60 = vpop.f32.mrf.mxu1  ;;  %v2106_v61 = vsel %vm2105_vm3, %v1777_v59, -inf }
 0x1cd   : > { %2107 = vmax.xlane.f32.xlu0 %v2106_v61  ;;  %v3489_v63 = vpop.f32.mrf.mxu0  ;;  %v2109_v5 = vsel %vm2105_vm3, %v1823_v60, -inf }
 0x1ce   : > { %v3495_v62 = vpop.f32.mrf.mxu1 }
 0x1cf   : > { %v1780_v0 = vpop.f32.mrf.mxu0 }
 0x1d0   : > { %v1826_v4 = vpop.f32.mrf.mxu1 }
 0x1d1   : > { %2110 = vmax.xlane.f32.xlu0 %v2109_v5  ;;  %v3490_v2 = vpop.f32.mrf.mxu0 }
 0x1d2   : > { %v3496_v6 = vpop.f32.mrf.mxu1 }
 0x1d3   : > { %v1869_v3 = vpop.f32.mrf.mxu0 }
 0x1d4   : > { %v1915_v7 = vpop.f32.mrf.mxu1  ;;  %v2112_v8 = vsel %vm2105_vm3, %v1869_v3, -inf }
 0x1d5   : > { %2113 = vmax.xlane.f32.xlu1 %v2112_v8  ;;  %v3501_v12 = vpop.f32.mrf.mxu0  ;;  %v2115_v15 = vsel %vm2105_vm3, %v1915_v7, -inf }
 0x1d6   : > { %v3507_v9 = vpop.f32.mrf.mxu1 }
 0x1d7   : > { %v1872_v13 = vpop.f32.mrf.mxu0 }
 0x1d8   : > { %v1918_v14 = vpop.f32.mrf.mxu1 }
 0x1d9   : > { %2116 = vmax.xlane.f32.xlu1 %v2115_v15  ;;  %v3502_v17 = vpop.f32.mrf.mxu0 }
 0x1da   : > { %v3508_v16 = vpop.f32.mrf.mxu1 }
 0x1db   : > { %v1961_v20 = vpop.f32.mrf.mxu0 }
 0x1dc   : > { %v2007_v10 = vpop.f32.mrf.mxu1  ;;  %v2118_v21 = vsel %vm2105_vm3, %v1961_v20, -inf }
 0x1dd   : > { %v2121_v11 = vsel %vm2105_vm3, %v2007_v10, -inf  ;;  %2119 = vmax.xlane.f32.xlu0 %v2118_v21  ;;  %v3513_v23 = vpop.f32.mrf.mxu0 }
 0x1de   : > { %v3519_v22 = vpop.f32.mrf.mxu1  ;;  %2122 = vmax.xlane.f32.xlu1 %v2121_v11 }
 0x1df   : > { %v1964_v24 = vpop.f32.mrf.mxu0 }
 0x1e0   : > { %v2010_v25 = vpop.f32.mrf.mxu1 }
 0x1e1   : > { %v3514_v26 = vpop.f32.mrf.mxu0 }
 0x1e2   : > { %v3520_v18 = vpop.f32.mrf.mxu1 }
 0x1e3   : > { %v2053_v27 = vpop.f32.mrf.mxu0 }
 0x1e4   : > { %v2099_v28 = vpop.f32.mrf.mxu1  ;;  %v2124_v30 = vsel %vm2105_vm3, %v2053_v27, -inf }
 0x1e5   : > { %v2127_v29 = vsel %vm2105_vm3, %v2099_v28, -inf  ;;  %2125 = vmax.xlane.f32.xlu0 %v2124_v30  ;;  %v3525_v35 = vpop.f32.mrf.mxu0 }
 0x1e6   : > { %v3531_v34 = vpop.f32.mrf.mxu1  ;;  %2128 = vmax.xlane.f32.xlu1 %v2127_v29 }
 0x1e7   : > { %v2056_v39 = vpop.f32.mrf.mxu0 }
 0x1e8   : > { %v2102_v40 = vpop.f32.mrf.mxu1 }
 0x1e9   : > { %v3526_v44 = vpop.f32.mrf.mxu0 }
 0x1ea   : > { %v3532_v45 = vpop.f32.mrf.mxu1 }
 0x256   : > { %v2108_v49 = vpop.xlane.xlu0 %2107 }
 0x257   : > { %v2130_v50 = vsub.f32 %v1777_v59, %v2108_v49 }
 0x259   : > { %v2138_v54 = vmul.f32 1.442695, %v2130_v50 }
 0x25a   : > { %v2111_v55 = vpop.xlane.xlu0 %2110 }
 0x25b   : > { %3718 = vpow2.f32 %v2138_v54  ;;  %v2131_v58 = vsub.f32 %v1823_v60, %v2111_v55 }
 0x25d   : > { %v2140_v61 = vmul.f32 1.442695, %v2131_v58 }
 0x25e   : > { %v2114_v62 = vpop.xlane.xlu1 %2113 }
 0x25f   : > { %3720 = vpow2.f32 %v2140_v61  ;;  %v2132_v63 = vsub.f32 %v1869_v3, %v2114_v62 }
 0x261   : > { %v2142_v0 = vmul.f32 1.442695, %v2132_v63 }
 0x262   : > { %v2117_v4 = vpop.xlane.xlu1 %2116 }
 0x263   : > { %3722 = vpow2.f32 %v2142_v0  ;;  %v2133_v5 = vsub.f32 %v1915_v7, %v2117_v4 }
 0x265   : > { %v2144_v6 = vmul.f32 1.442695, %v2133_v5 }
 0x266   : > { %v2120_v8 = vpop.xlane.xlu0 %2119 }
 0x267   : > { %v2123_v2 = vpop.xlane.xlu1 %2122  ;;  %3724 = vpow2.f32 %v2144_v6  ;;  %v2134_v12 = vsub.f32 %v1961_v20, %v2120_v8 }
 0x268   : > { %v2135_v9 = vsub.f32 %v2007_v10, %v2123_v2  ;;  %v3719_v13 = vpop.eup %3718 }
 0x269   : > { %v2146_v14 = vmul.f32 1.442695, %v2134_v12  ;;  %v2154_v15 = vsel %vm2105_vm3, %v3719_v13, 0.0 }
 0x26a   : > { %v2148_v59 = vmul.f32 1.442695, %v2135_v9  ;;  %2155 = vadd.xlane.f32.xlu0 %v2154_v15 }
 0x26c   : > { %3726 = vpow2.f32 %v2148_v59  ;;  %v3721_v60 = vpop.eup %3720 }
 0x26d   : > { %3728 = vpow2.f32 %v2146_v14  ;;  %v2157_v3 = vsel %vm2105_vm3, %v3721_v60, 0.0  ;;  %v2565_v14 = vld [vmem:[%s4499_s6 + $0x6] sm:$0x3] }
 0x26e   : > { %2158 = vadd.xlane.f32.xlu1 %v2157_v3  ;;  %v2126_v7 = vpop.xlane.xlu0 %2125 }
 0x26f   : > { %v2129_v16 = vpop.xlane.xlu1 %2128  ;;  %v2136_v11 = vsub.f32 %v2053_v27, %v2126_v7 }
 0x270   : > { %v2137_v17 = vsub.f32 %v2099_v28, %v2129_v16  ;;  %v3723_v21 = vpop.eup %3722  ;;  %v2713_v16 = vsel %vm2573_vm4, %v2565_v14, 0 }
 0x271   : > { %v2150_v10 = vmul.f32 1.442695, %v2136_v11  ;;  %v2160_v20 = vsel %vm2105_vm3, %v3723_v21, 0.0  ;;  %v2566_v11 = vld [vmem:[%s4499_s6 + $0x8] sm:$0x3] }
 0x272   : > { %v2152_v22 = vmul.f32 1.442695, %v2137_v17  ;;  %2161 = vadd.xlane.f32.xlu0 %v2160_v20  ;;  %v2759_v20 = vsel %vm2573_vm4, %v2566_v11, 0 }
 0x274   : > { %3730 = vpow2.f32 %v2152_v22  ;;  %v3725_v23 = vpop.eup %3724 }
 0x275   : > { %3732 = vpow2.f32 %v2150_v10  ;;  %v2163_v24 = vsel %vm2105_vm3, %v3725_v23, 0.0 }
 0x276   : > { %2164 = vadd.xlane.f32.xlu1 %v2163_v24 }
 0x279   : > { %v3727_v25 = vpop.eup %3726 }
 0x27a   : > { %v3729_v26 = vpop.eup %3728  ;;  %v2169_v18 = vsel %vm2105_vm3, %v3727_v25, 0.0 }
 0x27b   : > { %2170 = vadd.xlane.f32.xlu1 %v2169_v18  ;;  %v2166_v28 = vsel %vm2105_vm3, %v3729_v26, 0.0 }
 0x27c   : > { %2167 = vadd.xlane.f32.xlu0 %v2166_v28 }
 0x281   : > { %v4321_v27 = vpop.eup %3730 }
 0x282   : > { %v4323_v29 = vpop.eup %3732  ;;  %v2175_v30 = vsel %vm2105_vm3, %v4321_v27, 0.0 }
 0x283   : > { %2176 = vadd.xlane.f32.xlu1 %v2175_v30  ;;  %v2172_v34 = vsel %vm2105_vm3, %v4323_v29, 0.0 }
 0x284   : > { %2173 = vadd.xlane.f32.xlu0 %v2172_v34  ;;  %v2568_v34 = vld [vmem:[%s4499_s6 + $0xc] sm:$0x3] }
 0x2f3   : > { %v2156_v35 = vpop.xlane.xlu0 %2155 }
 0x2f4   : > { %3734 = vrcp.f32 %v2156_v35 }
 0x2f7   : > { %v2159_v39 = vpop.xlane.xlu1 %2158 }
 0x2f8   : > { %3736 = vrcp.f32 %v2159_v39 }
 0x2fb   : > { %v2162_v40 = vpop.xlane.xlu0 %2161 }
 0x2fc   : > { %3738 = vrcp.f32 %v2162_v40 }
 0x2ff   : > { %v2165_v44 = vpop.xlane.xlu1 %2164 }
 0x300   : > { %3740 = vrcp.f32 %v2165_v44 }
 0x301   : > { %v3735_v45 = vpop.eup %3734 }
 0x302   : > { %v2186_v49 = vmul.f32 %v3735_v45, %v3719_v13  ;;  %v2851_v45 = vsel %vm2573_vm4, %v2568_v34, 0 }
 0x304   : > { %v2171_v50 = vpop.xlane.xlu1 %2170  ;;  %v2194_v55 = vpack.c.bf16 %v2186_v49, %v2186_v49  ;;  %v2569_v49 = vld [vmem:[%s4499_s6 + $0xe] sm:$0x3] }
 0x305   : > { %3742 = vrcp.f32 %v2171_v50  ;;  %v2168_v54 = vpop.xlane.xlu0 %2167  ;;  %v3737_v58 = vpop.eup %3736 }
 0x306   : > { %3744 = vrcp.f32 %v2168_v54  ;;  %3536 = vmatmul.mubr.msk.bf16.vlgmr.msra.gmra.mxu0 %vm2105_vm3, %v2194_v55  ;;  %v2187_v61 = vmul.f32 %v3737_v58, %v3721_v60 }
 0x307   : > { %3546 = vmatpush3.bf16.msra.mxu0 %v2204_v33  ;;  %3547 = vmatprep.mubr.msk.bf16.mxu0 %vm3813_vm0, %v3812_v1 }
 0x308   : > { %v2195_v62 = vpack.c.bf16 %v2187_v61, %v2187_v61  ;;  %3557 = vmatprep.subr.bf16.mxu0 %v3812_v1  ;;  %v2897_v61 = vsel %vm2573_vm4, %v2569_v49, 0 }
 0x309   : > { %v3739_v63 = vpop.eup %3738 }
 0x30a   : > { %3542 = vmatmul.mubr.msk.bf16.vlgmr.msra.gmra.mxu1 %vm2105_vm3, %v2195_v62  ;;  %v2188_v0 = vmul.f32 %v3739_v63, %v3723_v21 }
 0x30b   : > { %3552 = vmatpush3.bf16.msra.mxu1 %v2205_v38  ;;  %3553 = vmatprep.mubr.msk.bf16.mxu1 %vm3813_vm0, %v3812_v1 }
 0x30c   : > { %v2177_v4 = vpop.xlane.xlu1 %2176  ;;  %v2196_v31 = vpack.c.bf16 %v2188_v0, %v2188_v0  ;;  %3563 = vmatprep.subr.bf16.mxu1 %v3812_v1 }
 0x30d   : > { %3746 = vrcp.f32 %v2177_v4  ;;  %v2174_v19 = vpop.xlane.xlu0 %2173  ;;  %v3741_v33 = vpop.eup %3740 }
 0x30e   : > { %3748 = vrcp.f32 %v2174_v19  ;;  %3548 = vmatmul.mubr.msk.bf16.vlgmr.msra.gmra.mxu0 %vm2105_vm3, %v2196_v31  ;;  %v2189_v5 = vmul.f32 %v3741_v33, %v3725_v23 }
 0x30f   : > { %3558 = vmatpush3.bf16.msra.mxu0 %v2206_v43  ;;  %3559 = vmatprep.mubr.msk.bf16.mxu0 %vm3813_vm0, %v3812_v1 }
 0x310   : > { %v2197_v32 = vpack.c.bf16 %v2189_v5, %v2189_v5  ;;  %3569 = vmatprep.subr.bf16.mxu0 %v3812_v1 }
 0x312   : > { %v3743_v36 = vpop.eup %3742  ;;  %3554 = vmatmul.mubr.msk.bf16.vlgmr.msra.gmra.mxu1 %vm2105_vm3, %v2197_v32 }
 0x313   : > { %v3745_v38 = vpop.eup %3744  ;;  %3564 = vmatpush3.bf16.msra.mxu1 %v2207_v48  ;;  %3565 = vmatprep.mubr.msk.bf16.mxu1 %vm3813_vm0, %v3812_v1  ;;  %v2191_v37 = vmul.f32 %v3743_v36, %v3727_v25  ;;  %v2562_v48 = vld [vmem:[%s4499_s6] sm:$0x3]  ;;  %v2567_v25 = vld [vmem:[%s4499_s6 + $0xa] sm:$0x3] }
 0x314   : > { %v2190_v6 = vmul.f32 %v3745_v38, %v3729_v26  ;;  %3575 = vmatprep.subr.bf16.mxu1 %v3812_v1  ;;  %v2575_v2 = vsel %vm2573_vm4, %v2562_v48, 0 }
 0x315   : > { %v2199_v43 = vpack.c.bf16 %v2191_v37, %v2191_v37 }
 0x316   : > { %v2198_v41 = vpack.c.bf16 %v2190_v6, %v2190_v6 }
 0x318   : > { %3560 = vmatmul.mubr.msk.bf16.vlgmr.msra.gmra.mxu0 %vm2105_vm3, %v2198_v41 }
 0x319   : > { %3570 = vmatpush3.bf16.msra.mxu0 %v2208_v53  ;;  %3571 = vmatprep.mubr.msk.bf16.mxu0 %vm3813_vm0, %v3812_v1 }
 0x31a   : > { %v3747_v42 = vpop.eup %3746  ;;  %3581 = vmatprep.subr.bf16.mxu0 %v3812_v1  ;;  %3566 = vmatmul.mubr.msk.bf16.vlgmr.msra.gmra.mxu1 %vm2105_vm3, %v2199_v43 }
 0x31b   : > { %v3749_v46 = vpop.eup %3748  ;;  %3576 = vmatpush3.bf16.msra.mxu1 %v2209_v57  ;;  %3577 = vmatprep.mubr.msk.bf16.mxu1 %vm3813_vm0, %v3812_v1  ;;  %v2193_v51 = vmul.f32 %v3747_v42, %v4321_v27  ;;  %v2564_v57 = vld [vmem:[%s4499_s6 + $0x4] sm:$0x3]  ;;  %v2805_v27 = vsel %vm2573_vm4, %v2567_v25, 0 }
 0x31c   : > { %v2192_v47 = vmul.f32 %v3749_v46, %v4323_v29  ;;  %3587 = vmatprep.subr.bf16.mxu1 %v3812_v1  ;;  %v2667_v13 = vsel %vm2573_vm4, %v2564_v57, 0 }
 0x31d   : > { %v2201_v8 = vpack.c.bf16 %v2193_v51, %v2193_v51 }
 0x31e   : > { %v2200_v53 = vpack.c.bf16 %v2192_v47, %v2192_v47 }
 0x320   : > { %3572 = vmatmul.mubr.msk.bf16.vlgmr.msra.gmra.mxu0 %vm2105_vm3, %v2200_v53 }
 0x321   : > { %3582 = vmatpush3.bf16.msra.mxu0 %v2575_v2  ;;  %3583 = vmatprep.mubr.msk.bf16.mxu0 %vm3813_vm0, %v3812_v1 }
 0x322   : > { %3593 = vmatprep.subr.bf16.mxu0 %v3812_v1  ;;  %3578 = vmatmul.mubr.msk.bf16.vlgmr.msra.gmra.mxu1 %vm2105_vm3, %v2201_v8 }
 0x323   : > { %3589 = vmatprep.mubr.msk.bf16.mxu1 %vm3813_vm0, %v3812_v1  ;;  %3588 = vmatpush3.bf16.msra.mxu1 %v2621_v56 }
 0x324   : > { %3599 = vmatprep.subr.bf16.mxu1 %v3812_v1 }
 0x3c6   : > { %v2247_v9 = vpop.f32.mrf.mxu0 }
 0x3c7   : > { %v2554_v12 = vpack.c.bf16 %v2247_v9, %v2247_v9 }
 0x3c8   : > { %v3537_v59 = vpop.f32.mrf.mxu0 }
 0x3c9   : > { %3584 = vmatmul.mubr.msk.bf16.vlgmr.msra.gmra.mxu0 %vm1736_vm2, %v2554_v12 }
 0x3ca   : > { %v2250_v15 = vpop.f32.mrf.mxu0  ;;  %v2290_v60 = vpop.f32.mrf.mxu1  ;;  %3594 = vmatpush3.bf16.msra.mxu0 %v2667_v13  ;;  %3595 = vmatprep.mubr.msk.bf16.mxu0 %vm3813_vm0, %v3812_v1 }
 0x3cb   : > { %v2555_v3 = vpack.c.bf16 %v2290_v60, %v2290_v60  ;;  %3605 = vmatprep.subr.bf16.mxu0 %v3812_v1 }
 0x3cc   : > { %v3538_v7 = vpop.f32.mrf.mxu0  ;;  %v3543_v17 = vpop.f32.mrf.mxu1 }
 0x3cd   : > { %3590 = vmatmul.mubr.msk.bf16.vlgmr.msra.gmra.mxu1 %vm1736_vm2, %v2555_v3 }
 0x3ce   : > { %v2293_v21 = vpop.f32.mrf.mxu1  ;;  %v2333_v22 = vpop.f32.mrf.mxu0  ;;  %3600 = vmatpush3.bf16.msra.mxu1 %v2713_v16  ;;  %3601 = vmatprep.mubr.msk.bf16.mxu1 %vm3813_vm0, %v3812_v1 }
 0x3cf   : > { %v2556_v10 = vpack.c.bf16 %v2333_v22, %v2333_v22  ;;  %3611 = vmatprep.subr.bf16.mxu1 %v3812_v1 }
 0x3d0   : > { %v3544_v23 = vpop.f32.mrf.mxu1  ;;  %v3549_v24 = vpop.f32.mrf.mxu0 }
 0x3d1   : > { %3596 = vmatmul.mubr.msk.bf16.vlgmr.msra.gmra.mxu0 %vm1736_vm2, %v2556_v10 }
 0x3d2   : > { %v2336_v26 = vpop.f32.mrf.mxu0  ;;  %v2376_v18 = vpop.f32.mrf.mxu1  ;;  %3606 = vmatpush3.bf16.msra.mxu0 %v2759_v20  ;;  %3607 = vmatprep.mubr.msk.bf16.mxu0 %vm3813_vm0, %v3812_v1 }
 0x3d3   : > { %v2557_v28 = vpack.c.bf16 %v2376_v18, %v2376_v18  ;;  %3617 = vmatprep.subr.bf16.mxu0 %v3812_v1 }
 0x3d4   : > { %v3550_v29 = vpop.f32.mrf.mxu0  ;;  %v3555_v30 = vpop.f32.mrf.mxu1 }
 0x3d5   : > { %3602 = vmatmul.mubr.msk.bf16.vlgmr.msra.gmra.mxu1 %vm1736_vm2, %v2557_v28 }
 0x3d6   : > { %v2379_v35 = vpop.f32.mrf.mxu1  ;;  %3612 = vmatpush3.bf16.msra.mxu1 %v2805_v27  ;;  %3613 = vmatprep.mubr.msk.bf16.mxu1 %vm3813_vm0, %v3812_v1 }
 0x3d7   : > { %3623 = vmatprep.subr.bf16.mxu1 %v3812_v1 }
 0x3d8   : > { %v2419_v39 = vpop.f32.mrf.mxu0  ;;  %v3556_v44 = vpop.f32.mrf.mxu1 }
 0x3d9   : > { %v2558_v40 = vpack.c.bf16 %v2419_v39, %v2419_v39  ;;  %v3166_v44 = vld [vmem:[%s4500_s7] ss:$0 sm:$0xff] }
 0x3da   : > { %v3561_v50 = vpop.f32.mrf.mxu0  ;;  %v2462_v54 = vpop.f32.mrf.mxu1 }
 0x3db   : > { %3608 = vmatmul.mubr.msk.bf16.vlgmr.msra.gmra.mxu0 %vm1736_vm2, %v2558_v40  ;;  %v2559_v58 = vpack.c.bf16 %v2462_v54, %v2462_v54 }
 0x3dc   : > { %v2422_v55 = vpop.f32.mrf.mxu0  ;;  %3618 = vmatpush3.bf16.msra.mxu0 %v2851_v45  ;;  %3619 = vmatprep.mubr.msk.bf16.mxu0 %vm3813_vm0, %v3812_v1  ;;  %v3567_v62 = vpop.f32.mrf.mxu1 }
 0x3dd   : > { %3614 = vmatmul.mubr.msk.bf16.vlgmr.msra.gmra.mxu1 %vm1736_vm2, %v2559_v58 }
 0x3de   : > { %v3562_v63 = vpop.f32.mrf.mxu0  ;;  %v2465_v0 = vpop.f32.mrf.mxu1  ;;  %3624 = vmatpush3.bf16.msra.mxu1 %v2897_v61  ;;  %3625 = vmatprep.mubr.msk.bf16.mxu1 %vm3813_vm0, %v3812_v1 }
 0x3e0   : > { %v2505_v4 = vpop.f32.mrf.mxu0  ;;  %v3568_v31 = vpop.f32.mrf.mxu1 }
 0x3e1   : > { %v2560_v19 = vpack.c.bf16 %v2505_v4, %v2505_v4 }
 0x3e2   : > { %v3573_v33 = vpop.f32.mrf.mxu0  ;;  %v2548_v5 = vpop.f32.mrf.mxu1 }
 0x3e3   : > { %3620 = vmatmul.mubr.msk.bf16.vlgmr.msra.gmra.mxu0 %vm1736_vm2, %v2560_v19  ;;  %v2561_v36 = vpack.c.bf16 %v2548_v5, %v2548_v5 }
 0x3e4   : > { %v2508_v32 = vpop.f32.mrf.mxu0  ;;  %v3579_v38 = vpop.f32.mrf.mxu1 }
 0x3e5   : > { %3626 = vmatmul.mubr.msk.bf16.vlgmr.msra.gmra.mxu1 %vm1736_vm2, %v2561_v36 }
 0x3e6   : > { %v3574_v6 = vpop.f32.mrf.mxu0  ;;  %v2551_v37 = vpop.f32.mrf.mxu1 }
 0x3e8   : > { %v3580_v41 = vpop.f32.mrf.mxu1 }
 0x489   : > { %v2611_v43 = vpop.f32.mrf.mxu0 }
 0x48a   : > { %v2939_v59 = vsel %vm394_vm1, %v2611_v43, 0.0 }
 0x48b   : > { %v3585_v42 = vpop.f32.mrf.mxu0 }
 0x48d   : > { %v2614_v46 = vpop.f32.mrf.mxu0  ;;  %v2657_v48 = vpop.f32.mrf.mxu1 }
 0x48e   : > { %v2940_v12 = vsel %vm394_vm1, %v2657_v48, 0.0 }
 0x48f   : > { %v3586_v1 = vpop.f32.mrf.mxu0  ;;  %v3591_v47 = vpop.f32.mrf.mxu1  ;;  %v2941_v60 = vadd.f32 %v2940_v12, %v2939_v59 }
 0x491   : > { %v2660_v51 = vpop.f32.mrf.mxu1  ;;  %v2703_v53 = vpop.f32.mrf.mxu0 }
 0x492   : > { %v2942_v14 = vsel %vm394_vm1, %v2703_v53, 0.0 }
 0x493   : > { %v3592_v2 = vpop.f32.mrf.mxu1  ;;  %v3597_v8 = vpop.f32.mrf.mxu0  ;;  %v2943_v17 = vadd.f32 %v2942_v14, %v2941_v60 }
 0x495   : > { %v2706_v52 = vpop.f32.mrf.mxu0  ;;  %v2749_v56 = vpop.f32.mrf.mxu1 }
 0x496   : > { %v2944_v16 = vsel %vm394_vm1, %v2749_v56, 0.0 }
 0x497   : > { %v3598_v57 = vpop.f32.mrf.mxu0  ;;  %v3603_v9 = vpop.f32.mrf.mxu1  ;;  %v2945_v10 = vadd.f32 %v2944_v16, %v2943_v17 }
 0x499   : > { %v2752_v13 = vpop.f32.mrf.mxu1 }
 0x49b   : > { %v2795_v15 = vpop.f32.mrf.mxu0  ;;  %v3604_v3 = vpop.f32.mrf.mxu1 }
 0x49c   : > { %v2946_v21 = vsel %vm394_vm1, %v2795_v15, 0.0 }
 0x49d   : > { %v3609_v7 = vpop.f32.mrf.mxu0  ;;  %v2841_v11 = vpop.f32.mrf.mxu1  ;;  %v2947_v25 = vadd.f32 %v2946_v21, %v2945_v10 }
 0x49e   : > { %v2948_v23 = vsel %vm394_vm1, %v2841_v11, 0.0 }
 0x49f   : > { %v2798_v22 = vpop.f32.mrf.mxu0  ;;  %v3615_v20 = vpop.f32.mrf.mxu1  ;;  %v2949_v28 = vadd.f32 %v2948_v23, %v2947_v25 }
 0x4a1   : > { %v3610_v24 = vpop.f32.mrf.mxu0  ;;  %v2844_v26 = vpop.f32.mrf.mxu1 }
 0x4a3   : > { %v2887_v18 = vpop.f32.mrf.mxu0  ;;  %v3616_v29 = vpop.f32.mrf.mxu1 }
 0x4a4   : > { %v2950_v27 = vsel %vm394_vm1, %v2887_v18, 0.0 }
 0x4a5   : > { %v3621_v30 = vpop.f32.mrf.mxu0  ;;  %v2951_v34 = vadd.f32 %v2950_v27, %v2949_v28  ;;  %v2933_v35 = vpop.f32.mrf.mxu1 }
 0x4a6   : > { %v2952_v40 = vsel %vm394_vm1, %v2933_v35, 0.0 }
 0x4a7   : > { %v2890_v39 = vpop.f32.mrf.mxu0  ;;  %v2953_v45 = vadd.f32 %v2952_v40, %v2951_v34  ;;  %v3627_v49 = vpop.f32.mrf.mxu1 }
 0x4a9   : > { %v3622_v50 = vpop.f32.mrf.mxu0  ;;  %v2961_v54 = vadd.f32 %v3166_v44, %v2953_v45  ;;  %v2936_v55 = vpop.f32.mrf.mxu1 }
 0x4ab   : > { %v3628_v58 = vpop.f32.mrf.mxu1  ;;  %2962 = vst.msk [vmem:[%s326_s24] sm:$0xff] %vm394_vm1, %v2961_v54 }
 0x4ac   : > { %3763 = shalt.err (!%p3760_p3)
}
 0x4ad   : > { %s3764_s17 = scalar_lea.hbm %s4455_s13, 128  ;;  %s3768_s23 = scalar_lea.hbm %s4501_s8, 256 }
 0x4ae   : > { %p3765_p4 = scmp.ne.s32.totalorder %s4455_s13, %s3764_s17  ;;  %p3769_p9 = scmp.lt.s32.totalorder %s4455_s13, %s4501_s8 }
 0x4af   : > { %p3770_p10 = scmp.lt.s32.totalorder %s3768_s23, %s3764_s17 }
 0x4b0   : > { %p3766_p7 = pnand %p3765_p4, %p3898_p5 }
 0x4b1   : > { %p3771_p11 = por %p3770_p10, %p3769_p9 }
 0x4b2   : > { %p3767_p8 = pneg %p3766_p7 }
 0x4b4   : > { %p3772_p12 = pnand %p3771_p11, %p3767_p8 }
 0x4b6   : > { %3775 = shalt.err (!%p3772_p12)
}
 0x4b7   : > { %3629 = dma.vmem_to_hbm [thread:$0]  (%p3898_p5), %s2978_s26, 128, %s4455_s13, %s2964_s18  }
 0x4b8 PF: > { %p3635_p13 = scmp.ge.s32.totalorder %s3810_s30, 2  ;;  %s2989_s12 = sand.u32 1, %s3798_s27  }
 0x4b9   : > { %s2990_s19 = scalar_lea.sflag [#allocation3], %s2989_s12 }
 0x4ba   : > { %p3632_p0 = pnand %p3635_p13, %p3902_p6 }
 0x4bc   : > { %p3633_p1 = pneg %p3632_p0 }
 0x4be   : > { %3793 = dma.done.wait (%p3633_p1), %s2990_s19, 128  }
 0x4bf   : > { %3795 = vsyncadd (%p3633_p1), %s2990_s19, 4294967168  ;;  %p18_p2 = scmp.ge.s32.totalorder %s3885_s11, 4   ;;  %s4504_s27 = smov %s3802_s28 }
 0x4c0   : > { %s4505_s28 = smov %s3806_s29  ;;  %s4506_s29 = smov %s3896_s14 }
 0x4c1   : > { %s4507_s30 = smov %s3885_s11  ;;  %20 = sbr.rel (!%p18_p2) target bundleno = 3 (0x3), region = 93 }
 0x4c6   :  { %2995 = vsyncpa [#allocation3], 1 }
 0x4c7   :  { %2997 = vsyncpa [#allocation3 + $0x1], 1 }

</bundles_post_ra>
